<compile_context>
chip_gen: v7x
topology: tpu7x:2x2x1
jax: 0.10.0
libtpu: 0.0.40
codegen_flags: <defaults>
</compile_context>

<pallas_src>
import numpy as np
import jax
import jax.numpy as jnp
from jax.experimental import pallas as pl
from jax.experimental.pallas import tpu as pltpu


def _spl_kernel(row_ref,    # (2, TJ)   packed j-side rows: [o, stratum]
                col_ref,    # (TI, 3)   packed i-side cols: [o, event, stratum]
                term_ref,   # (TI, 1)   per-row event-weighted loss term
                acc_ref):   # (TI, 128) f32 partial risk sums (scratch)
    i = pl.program_id(0)
    j = pl.program_id(1)
    nj = pl.num_programs(1)
    TI = acc_ref.shape[0]
    TJ = row_ref.shape[1]

    @pl.when(j == 0)
    def _init():
        acc_ref[...] = jnp.zeros_like(acc_ref)

    # Strictly-lower-triangular blocks can never satisfy j_global >= i_global:
    # skip all of their O(TI*TJ) compare/select/add work.
    @pl.when((j + 1) * TJ > i * TI)
    def _compute():
        o_row = row_ref[0:1, :]                       # (1, TJ)
        s_row = row_ref[1:2, :]                       # (1, TJ)
        s_col = col_ref[:, 2:3]                       # (TI, 1)

        exp_o = jnp.exp(o_row)                        # (1, TJ): O(N) EUP work

        # Global sorted indices from iota + block offsets (no rank streams).
        jj = jax.lax.broadcasted_iota(jnp.int32, (1, TJ), 1) + j * TJ
        ii = jax.lax.broadcasted_iota(jnp.int32, (TI, 1), 0) + i * TI

        # Implicit (TI,1) x (1,TJ) broadcasting -> (TI,TJ); no broadcast_to.
        mask = (s_row == s_col) & (jj >= ii)
        contrib = jnp.where(mask, exp_o, jnp.float32(0.0))   # (TI, TJ)

        # Accumulate in 128-lane chunks: pure VPU vreg adds in the inner loop;
        # the single cross-lane (XLU) reduction happens once, in the epilogue.
        upd = acc_ref[...]
        for k in range(TJ // 128):
            upd = upd + contrib[:, k * 128:(k + 1) * 128]
        acc_ref[...] = upd

    @pl.when(j == nj - 1)
    def _finalize():
        o_col = col_ref[:, 0:1]                       # (TI, 1)
        e_col = col_ref[:, 1:2]                       # (TI, 1)
        risk = jnp.sum(acc_ref[...], axis=1, keepdims=True)  # (TI, 1)
        # Padding / censored rows select 0 (no NaN from the unselected branch).
        term_ref[...] = jnp.where(e_col > 0.0,
                                  o_col - jnp.log(risk),
                                  jnp.float32(0.0))


def _pick_tile(n, candidates):
    for c in candidates:
        if n % c == 0:
            return c
    return n


def stratified_partial_likelihood_loss(output, event_time, event_indicator,
                                        strata=None):
    """output: (N,) float; event_time: (N,) int/float; event_indicator: (N,) bool;
       strata: (N,) int or None. Returns scalar float32 loss."""
    N = output.shape[0]
    if strata is None:
        strata = jnp.ones((N,), jnp.int32)

    o = jnp.asarray(output, jnp.float32)
    e = jnp.asarray(event_indicator, jnp.float32)
    s = jnp.asarray(strata, jnp.int32)
    t = jnp.asarray(event_time)

    # Stable sort by event time: after sorting, "rank_j >= rank_i" == "j >= i".
    order = jnp.argsort(t, stable=True)
    o = o[order]
    e = e[order]
    s = s[order]

    # Dense stratum ids in [0, N) (exact as f32 for N << 2^24) and a
    # per-stratum max shift: the loss is exactly invariant to a per-stratum
    # constant shift, and this prevents exp overflow AND the "whole stratum
    # underflows under a global-max shift" hazard.
    dense = jnp.searchsorted(jnp.sort(s), s, side="left").astype(jnp.int32)
    seg_max = jax.ops.segment_max(o, dense, num_segments=N)
    o = o - seg_max[dense]

    Np = max(128, -(-N // 128) * 128)
    pad = Np - N
    o_p = jnp.pad(o, (0, pad))
    e_p = jnp.pad(e, (0, pad))
    # Pad stratum -1.0 never matches a real dense id in [0, N); padded rows
    # also have event=0 so they contribute nothing.
    s_p = jnp.pad(dense.astype(jnp.float32), (0, pad), constant_values=-1.0)

    row_pack = jnp.stack([o_p, s_p], axis=0)          # (2, Np)  j-side stream
    col_pack = jnp.stack([o_p, e_p, s_p], axis=1)     # (Np, 3)  i-side stream

    # Tiles: large enough to amortize per-grid-step overhead, still ~1-2 MiB of
    # VMEM at the largest setting (fits default scoped VMEM on v5e/v6e/v7x).
    # Cap TI so the "parallel" i axis has >= 2 blocks (keeps both v7x
    # TensorCores busy); harmless on v5e/v6e.
    TI = _pick_tile(Np, (512, 256, 128))
    if Np >= 256:
        TI = min(TI, Np // 2)
    TJ = _pick_tile(Np, (4096, 2048, 1024, 512, 256, 128))
    grid = (Np // TI, Np // TJ)

    n_i = Np // TI
    cost = pl.CostEstimate(
        flops=3 * Np * Np,                      # compare/select/add (~half skipped)
        transcendentals=n_i * Np + Np,          # exp per (i-block, j) + final logs
        bytes_accessed=4 * (2 * Np * n_i + 3 * Np + Np),
    )

    terms = pl.pallas_call(
        _spl_kernel,
        out_shape=jax.ShapeDtypeStruct((Np, 1), jnp.float32),
        grid_spec=pltpu.PrefetchScalarGridSpec(
            num_scalar_prefetch=0,
            grid=grid,
            in_specs=[pl.BlockSpec((2, TJ), lambda i, j: (0, j)),
                      pl.BlockSpec((TI, 3), lambda i, j: (i, 0))],
            out_specs=pl.BlockSpec((TI, 1), lambda i, j: (i, 0)),
            scratch_shapes=[pltpu.VMEM((TI, 128), jnp.float32)],
        ),
        compiler_params=pltpu.CompilerParams(
            dimension_semantics=("parallel", "arbitrary")),
        cost_estimate=cost,
    )(row_pack, col_pack)

    return -jnp.sum(terms)


def _reference_loss(output, event_time, event_indicator, strata):
    """NumPy/float64 port of the PyTorch module (stable-sort tie-break)."""
    output = np.asarray(output, np.float64)
    event_time = np.asarray(event_time)
    event_indicator = np.asarray(event_indicator, bool)
    strata = np.asarray(strata)
    total = 0.0
    for strat in np.unique(strata):
        idx = np.where(strata == strat)[0]
        o = output[idx]
        t = event_time[idx]
        e = event_indicator[idx]
        order = np.argsort(t, kind="stable")
        o = o[order]
        e = e[order]
        acc = np.log(np.cumsum(np.exp(o)[::-1])[::-1])
        total += -np.sum(o[e] - acc[e])
    return np.float64(total)


def _check(loss, ref, what, atol=1e-3):
    if not np.allclose(np.asarray(loss), ref, rtol=1e-4, atol=atol):
        raise AssertionError(f"mismatch ({what}): pallas={float(loss)} ref={float(ref)}")


if __name__ == "__main__":
    key = jax.random.PRNGKey(0)
    k1, k2, k3, k4 = jax.random.split(key, 4)

    # Small case (single-tile grid, heavy padding: N=16 -> Np=128).
    N = 16
    output = jax.random.normal(k1, (N,), jnp.float32)
    event_time = jax.random.randint(k2, (N,), 0, 20, jnp.int32)
    event_indicator = jax.random.bernoulli(k3, 0.6, (N,))
    strata = jax.random.randint(k4, (N,), 0, 3, jnp.int32)

    loss = jax.block_until_ready(
        stratified_partial_likelihood_loss(output, event_time, event_indicator, strata))
    ref = _reference_loss(np.asarray(output), np.asarray(event_time),
                          np.asarray(event_indicator), np.asarray(strata))
    _check(loss, ref, "small, strata")

    # strata=None default path.
    loss_none = jax.block_until_ready(
        stratified_partial_likelihood_loss(output, event_time, event_indicator, None))
    ref_none = _reference_loss(np.asarray(output), np.asarray(event_time),
                               np.asarray(event_indicator), np.ones(N, np.int32))
    _check(loss_none, ref_none, "small, no strata")

    # Larger case exercising the multi-tile grid, the cross-j accumulator and
    # the lower-triangular block skip (N=300 -> Np=384, grid=(3,3)).
    k5, k6, k7, k8 = jax.random.split(jax.random.PRNGKey(1), 4)
    N2 = 300
    output2 = jax.random.normal(k5, (N2,), jnp.float32)
    event_time2 = jax.random.randint(k6, (N2,), 0, 50, jnp.int32)
    event_indicator2 = jax.random.bernoulli(k7, 0.6, (N2,))
    strata2 = jax.random.randint(k8, (N2,), 0, 4, jnp.int32)

    loss2 = jax.block_until_ready(
        stratified_partial_likelihood_loss(output2, event_time2, event_indicator2, strata2))
    ref2 = _reference_loss(np.asarray(output2), np.asarray(event_time2),
                           np.asarray(event_indicator2), np.asarray(strata2))
    _check(loss2, ref2, "large, strata", atol=1e-2)

    # One stratum sits ~200 below the global max: exercises the per-stratum
    # max shift (a global-max shift would underflow this whole stratum).
    output3 = output2 - jnp.where(strata2 == 0, jnp.float32(200.0), jnp.float32(0.0))
    loss3 = jax.block_until_ready(
        stratified_partial_likelihood_loss(output3, event_time2, event_indicator2, strata2))
    ref3 = _reference_loss(np.asarray(output3), np.asarray(event_time2),
                           np.asarray(event_indicator2), np.asarray(strata2))
    _check(loss3, ref3, "offset stratum", atol=1e-2)

    print("KERNEL_OK")
</pallas_src>

<mosaic_0001>
module attributes {stable_mosaic.version = 11 : i64} {
  func.func @_spl_kernel(%arg0: i32, %arg1: i32, %arg2: memref<2x128xf32, #tpu.memory_space<vmem>>, %arg3: memref<128x3xf32, #tpu.memory_space<vmem>>, %arg4: memref<128x1xf32, #tpu.memory_space<vmem>>, %arg5: memref<128x128xf32, #tpu.memory_space<vmem>>) attributes {dimension_semantics = [#tpu.dimension_semantics<parallel>, #tpu.dimension_semantics<arbitrary>], iteration_bounds = array<i64: 1, 1>, scalar_prefetch = 0 : i64, scratch_operands = 1 : i64, tpu.core_type = #tpu.core_type<tc>, window_params = [{transform_indices = @transform_0, window_bounds = array<i64: 2, 128>}, {transform_indices = @transform_1, window_bounds = array<i64: 128, 3>}, {transform_indices = @transform_2, window_bounds = array<i64: 128, 1>}]} {
    %c0_i32 = arith.constant 0 : i32
    %0 = arith.cmpi eq, %arg1, %c0_i32 : i32
    %1 = arith.extui %0 : i1 to i32
    %c0_i32_0 = arith.constant 0 : i32
    %2 = arith.cmpi ne, %1, %c0_i32_0 : i32
    scf.if %2 {
      %cst = arith.constant 0.000000e+00 : f32
      %12 = vector.broadcast %cst : f32 to vector<128x128xf32>
      %c0 = arith.constant 0 : index
      %c0_5 = arith.constant 0 : index
      %13 = vector.load %arg5[%c0, %c0_5] : memref<128x128xf32, #tpu.memory_space<vmem>>, vector<128x128xf32>
      tpu.vector_store %arg5[%c0, %c0_5], %12 {strides = array<i32>} : memref<128x128xf32, #tpu.memory_space<vmem>>, vector<128x128xf32>,
    } else {
    }
    %c1_i32 = arith.constant 1 : i32
    %3 = arith.addi %arg1, %c1_i32 : i32
    %c128_i32 = arith.constant 128 : i32
    %4 = arith.muli %3, %c128_i32 : i32
    %c128_i32_1 = arith.constant 128 : i32
    %5 = arith.muli %arg0, %c128_i32_1 : i32
    %6 = arith.cmpi sgt, %4, %5 : i32
    %7 = arith.extui %6 : i1 to i32
    %c0_i32_2 = arith.constant 0 : i32
    %8 = arith.cmpi ne, %7, %c0_i32_2 : i32
    scf.if %8 {
      %c0 = arith.constant 0 : index
      %c0_5 = arith.constant 0 : index
      %12 = vector.load %arg2[%c0, %c0_5] : memref<2x128xf32, #tpu.memory_space<vmem>>, vector<1x128xf32>
      %c1 = arith.constant 1 : index
      %c0_6 = arith.constant 0 : index
      %13 = vector.load %arg2[%c1, %c0_6] : memref<2x128xf32, #tpu.memory_space<vmem>>, vector<1x128xf32>
      %c0_7 = arith.constant 0 : index
      %c2 = arith.constant 2 : index
      %14 = vector.load %arg3[%c0_7, %c2] : memref<128x3xf32, #tpu.memory_space<vmem>>, vector<128x1xf32>
      %15 = math.exp %12 : vector<1x128xf32>
      %16 = tpu.iota {dimensions = array<i32: 1>} : vector<1x128xi32>
      %c128_i32_8 = arith.constant 128 : i32
      %17 = arith.muli %arg1, %c128_i32_8 : i32
      %18 = vector.broadcast %17 : i32 to vector<1x128xi32>
      %19 = arith.addi %16, %18 : vector<1x128xi32>
      %20 = tpu.iota {dimensions = array<i32: 0>} : vector<128x1xi32>
      %c128_i32_9 = arith.constant 128 : i32
      %21 = arith.muli %arg0, %c128_i32_9 : i32
      %22 = vector.broadcast %21 : i32 to vector<128x1xi32>
      %23 = arith.addi %20, %22 : vector<128x1xi32>
      %24 = vector.broadcast %13 : vector<1x128xf32> to vector<128x128xf32>
      %25 = vector.broadcast %14 : vector<128x1xf32> to vector<128x128xf32>
      %26 = arith.cmpf oeq, %24, %25 : vector<128x128xf32>
      %27 = vector.broadcast %19 : vector<1x128xi32> to vector<128x128xi32>
      %28 = vector.broadcast %23 : vector<128x1xi32> to vector<128x128xi32>
      %29 = arith.cmpi sge, %27, %28 : vector<128x128xi32>
      %30 = arith.andi %26, %29 : vector<128x128xi1>
      %cst = arith.constant 0.000000e+00 : f32
      %31 = vector.shape_cast %15 : vector<1x128xf32> to vector<1x128xf32>
      %32 = vector.broadcast %31 : vector<1x128xf32> to vector<128x128xf32>
      %33 = vector.broadcast %cst : f32 to vector<128x128xf32>
      %34 = arith.select %30, %32, %33 : vector<128x128xi1>, vector<128x128xf32>
      %c0_10 = arith.constant 0 : index
      %c0_11 = arith.constant 0 : index
      %35 = vector.load %arg5[%c0_10, %c0_11] : memref<128x128xf32, #tpu.memory_space<vmem>>, vector<128x128xf32>
      %36 = arith.addf %35, %34 : vector<128x128xf32>
      %c0_12 = arith.constant 0 : index
      %c0_13 = arith.constant 0 : index
      %37 = vector.load %arg5[%c0_12, %c0_13] : memref<128x128xf32, #tpu.memory_space<vmem>>, vector<128x128xf32>
      tpu.vector_store %arg5[%c0_12, %c0_13], %36 {strides = array<i32>} : memref<128x128xf32, #tpu.memory_space<vmem>>, vector<128x128xf32>,
    } else {
    }
    %c0_i32_3 = arith.constant 0 : i32
    %9 = arith.cmpi eq, %arg1, %c0_i32_3 : i32
    %10 = arith.extui %9 : i1 to i32
    %c0_i32_4 = arith.constant 0 : i32
    %11 = arith.cmpi ne, %10, %c0_i32_4 : i32
    scf.if %11 {
      %c0 = arith.constant 0 : index
      %c0_5 = arith.constant 0 : index
      %12 = vector.load %arg3[%c0, %c0_5] : memref<128x3xf32, #tpu.memory_space<vmem>>, vector<128x1xf32>
      %c0_6 = arith.constant 0 : index
      %c1 = arith.constant 1 : index
      %13 = vector.load %arg3[%c0_6, %c1] : memref<128x3xf32, #tpu.memory_space<vmem>>, vector<128x1xf32>
      %c0_7 = arith.constant 0 : index
      %c0_8 = arith.constant 0 : index
      %14 = vector.load %arg5[%c0_7, %c0_8] : memref<128x128xf32, #tpu.memory_space<vmem>>, vector<128x128xf32>
      %cst = arith.constant dense<0.000000e+00> : vector<128xf32>
      %15 = vector.multi_reduction <add>, %14, %cst [1] : vector<128x128xf32> to vector<128xf32>
      %16 = vector.shape_cast %15 : vector<128xf32> to vector<128x1xf32>
      %cst_9 = arith.constant 0.000000e+00 : f32
      %17 = vector.broadcast %cst_9 : f32 to vector<128x1xf32>
      %18 = arith.cmpf ogt, %13, %17 : vector<128x1xf32>
      %19 = math.log %16 : vector<128x1xf32>
      %20 = arith.subf %12, %19 : vector<128x1xf32>
      %cst_10 = arith.constant 0.000000e+00 : f32
      %21 = vector.broadcast %cst_10 : f32 to vector<128x1xf32>
      %22 = arith.select %18, %20, %21 : vector<128x1xi1>, vector<128x1xf32>
      %c0_11 = arith.constant 0 : index
      %c0_12 = arith.constant 0 : index
      %23 = vector.load %arg4[%c0_11, %c0_12] : memref<128x1xf32, #tpu.memory_space<vmem>>, vector<128x1xf32>
      tpu.vector_store %arg4[%c0_11, %c0_12], %22 {strides = array<i32>} : memref<128x1xf32, #tpu.memory_space<vmem>>, vector<128x1xf32>,
    } else {
    }
    return
  }
  func.func @transform_0(%arg0: i32, %arg1: i32) -> (i32, i32) {
    %c0_i32 = arith.constant 0 : i32
    %c0_i32_0 = arith.constant 0 : i32
    return %c0_i32, %arg1 : i32, i32
  }
  func.func @transform_1(%arg0: i32, %arg1: i32) -> (i32, i32) {
    %c0_i32 = arith.constant 0 : i32
    %c0_i32_0 = arith.constant 0 : i32
    return %arg0, %c0_i32 : i32, i32
  }
  func.func @transform_2(%arg0: i32, %arg1: i32) -> (i32, i32) {
    %c0_i32 = arith.constant 0 : i32
    %c0_i32_0 = arith.constant 0 : i32
    return %arg0, %c0_i32 : i32, i32
  }
}

</mosaic_0001>

<bundles_post_ra>
// kernel: tpu_custom_call.1
= control target key start
LH: loop header
LB: loop body
LE: loop exit
PB: predicated region body
PF: predicated region fallthrough
CT: control target
= control target key end

     0   :  { %v633_v0 = vmov 2   ;;  %v58_v19 = vlaneseq  ;;  %s635_s16 = smov 127   ;;  %s960_s1 = inlined_call_operand.vmem [shape: f32[128,3], index: 1, kind: input, shape index: {}]   ;;  %s961_s0 = inlined_call_operand.vmem [shape: f32[2,128], index: 0, kind: input, shape index: {}]   ;;  %s962_s2 = inlined_call_operand.vmem [shape: f32[128,1], index: 2, kind: output, shape index: {}]  }
   0x1   :  { %598 = vset.pattern.permute.xlu1 %v633_v0  ;;  %597 = vset.pattern.permute.xlu0 %v633_v0  ;;  %v654_v1 = vld [vmem:[%s960_s1 + $0x10] sm:$0xff]  ;;  %v659_v2 = vld [vmem:[%s960_s1] sm:$0xff]  ;;  %v666_v3 = vld [vmem:[%s960_s1 + $0x18] sm:$0xff] }
   0x2   :  { %113 = vperm.xlu1 %598, %v654_v1   ;;  %103 = vperm.xlu0 %597, %v659_v2   ;;  %v671_v4 = vld [vmem:[%s960_s1 + $0x8] sm:$0xff]  ;;  %v683_v6 = vld [vmem:[%s960_s1 + $0x20] sm:$0xff]  ;;  %v690_v7 = vld [vmem:[%s960_s1 + $0x38] sm:$0xff]  ;;  %v750_v20 = vshrl.u32 %v58_v19, 7  ;;  %v753_v22 = vand.u32 127, %v58_v19 }
   0x3   :  { %v678_v5 = vld [vmem:[%s960_s1 + $0x28] sm:$0xff]  ;;  %v695_v8 = vld [vmem:[%s960_s1 + $0x30] sm:$0xff]  ;;  %v707_v10 = vld [vmem:[%s960_s1 + $0x40] sm:$0xff] }
   0x4   :  { %v702_v9 = vld [vmem:[%s960_s1 + $0x48] sm:$0xff]  ;;  %v714_v11 = vld [vmem:[%s960_s1 + $0x58] sm:$0xff]  ;;  %v719_v12 = vld [vmem:[%s960_s1 + $0x50] sm:$0xff]  ;;  %v231_v21 = vsub.s32 0, %v750_v20  ;;  %v66_v24 = vadd.s32 16, %v750_v20  ;;  %vm197_vm0 = vcmp.ge.s32.totalorder %v753_v22, %v750_v20  ;;  %v65_v27 = vadd.s32 8, %v750_v20 }
   0x5   :  { %v726_v13 = vld [vmem:[%s960_s1 + $0x68] sm:$0xff]  ;;  %v731_v14 = vld [vmem:[%s960_s1 + $0x60] sm:$0xff]  ;;  %v738_v15 = vld [vmem:[%s960_s1 + $0x78] sm:$0xff]  ;;  %v67_v30 = vadd.s32 24, %v750_v20  ;;  %v68_v33 = vadd.s32 32, %v750_v20  ;;  %v69_v37 = vadd.s32 40, %v750_v20 }
   0x6   :  { %118 = vperm.xlu1 %598, %v666_v3   ;;  %108 = vperm.xlu0 %597, %v671_v4   ;;  %v743_v16 = vld [vmem:[%s960_s1 + $0x70] sm:$0xff]  ;;  %v38_v17 = vld [vmem:[%s961_s0] sm:$0x1]  ;;  %v759_v25 = vld [vmem:[%s961_s0 + $0x1] ss:$0 sm:$0xff]  ;;  %vm199_vm1 = vcmp.ge.s32.totalorder %v753_v22, %v66_v24  ;;  %vm198_vm5 = vcmp.ge.s32.totalorder %v753_v22, %v65_v27  ;;  %v70_v39 = vadd.s32 48, %v750_v20 }
   0x7   :  { %v56_v18 = vmul.f32 1.442695, %v38_v17  ;;  %vm200_vm7 = vcmp.ge.s32.totalorder %v753_v22, %v67_v30  ;;  %vm201_vm11 = vcmp.ge.s32.totalorder %v753_v22, %v68_v33  ;;  %vm202_vm15 = vcmp.ge.s32.totalorder %v753_v22, %v69_v37  ;;  %s634_s0 = smov 1  }
   0x8   :  { %v71_v42 = vadd.s32 56, %v750_v20  ;;  %v72_v45 = vadd.s32 64, %v750_v20  ;;  %v73_v48 = vadd.s32 72, %v750_v20  ;;  %v74_v51 = vadd.s32 80, %v750_v20 }
   0x9   :  { %599 = vpow2.f32 %v56_v18  ;;  %v75_v54 = vadd.s32 88, %v750_v20  ;;  %v76_v57 = vadd.s32 96, %v750_v20  ;;  %v77_v60 = vadd.s32 104, %v750_v20 }
   0xa   :  { %128 = vperm.xlu1 %598, %v678_v5   ;;  %123 = vperm.xlu0 %597, %v683_v6   ;;  %v78_v63 = vadd.s32 112, %v750_v20  ;;  %v79_v18 = vadd.s32 120, %v750_v20 }
   0xe   :  { %138 = vperm.xlu1 %598, %v690_v7   ;;  %133 = vperm.xlu0 %597, %v695_v8  }
  0x12   :  { %148 = vperm.xlu1 %598, %v702_v9   ;;  %143 = vperm.xlu0 %597, %v707_v10  }
  0x13   :  { %v600_v23 = vpop.eup %599 }
  0x14   :  { %v761_v26 = vrot.slane %v600_v23, %v231_v21 }
  0x16   :  { %158 = vperm.xlu1 %598, %v714_v11   ;;  %153 = vperm.xlu0 %597, %v719_v12  }
  0x1a   :  { %168 = vperm.xlu1 %598, %v726_v13   ;;  %163 = vperm.xlu0 %597, %v731_v14  }
  0x1e   :  { %178 = vperm.xlu1 %598, %v738_v15   ;;  %173 = vperm.xlu0 %597, %v743_v16  }
  0x81   :  { %v114_v28 = vpop.permute.xlu1 %113  ;;  %v104_v29 = vpop.permute.xlu0 %103 }
  0x82   :  { %vm183_vm2 = vcmp.eq.f32.partialorder %v759_v25, %v114_v28  ;;  %vm181_vm3 = vcmp.eq.f32.partialorder %v759_v25, %v104_v29 }
  0x83   :  { %vm213_vm4 = vmand %vm181_vm3, %vm197_vm0 }
  0x84   :  { %v233_v31 = vsel %vm213_vm4, %v761_v26, 0.0  ;;  %vm772_vm6 = vmand %vm183_vm2, %vm199_vm1  ;;  %vm203_vm1 = vcmp.ge.s32.totalorder %v753_v22, %v70_v39 }
  0x85   :  { %v119_v34 = vpop.permute.xlu1 %118  ;;  %v109_v35 = vpop.permute.xlu0 %108  ;;  %332 = vadd.xlane.f32.xlu0 %v233_v31  ;;  %v235_v36 = vsel %vm772_vm6, %v761_v26, 0.0 }
  0x86   :  { %vm184_vm8 = vcmp.eq.f32.partialorder %v759_v25, %v119_v34  ;;  %vm182_vm9 = vcmp.eq.f32.partialorder %v759_v25, %v109_v35 }
  0x87   :  { %vm214_vm10 = vmand %vm182_vm9, %vm198_vm5  ;;  %vm204_vm5 = vcmp.ge.s32.totalorder %v753_v22, %v71_v42 }
  0x88   :  { %v234_v38 = vsel %vm214_vm10, %v761_v26, 0.0  ;;  %vm216_vm12 = vmand %vm184_vm8, %vm200_vm7  ;;  %vm205_vm7 = vcmp.ge.s32.totalorder %v753_v22, %v72_v45 }
  0x89   :  { %v129_v40 = vpop.permute.xlu1 %128  ;;  %v124_v41 = vpop.permute.xlu0 %123  ;;  %334 = vadd.xlane.f32.xlu1 %v234_v38  ;;  %336 = vadd.xlane.f32.xlu0 %v235_v36  ;;  %v236_v44 = vsel %vm216_vm12, %v761_v26, 0.0 }
  0x8a   :  { %vm186_vm13 = vcmp.eq.f32.partialorder %v759_v25, %v129_v40  ;;  %vm185_vm14 = vcmp.eq.f32.partialorder %v759_v25, %v124_v41 }
  0x8b   :  { %vm217_vm0 = vmand %vm185_vm14, %vm201_vm11  ;;  %vm206_vm11 = vcmp.ge.s32.totalorder %v753_v22, %v73_v48 }
  0x8c   :  { %v237_v43 = vsel %vm217_vm0, %v761_v26, 0.0  ;;  %vm218_vm2 = vmand %vm186_vm13, %vm202_vm15  ;;  %vm207_vm13 = vcmp.ge.s32.totalorder %v753_v22, %v74_v51 }
  0x8d   :  { %v139_v46 = vpop.permute.xlu1 %138  ;;  %v134_v47 = vpop.permute.xlu0 %133  ;;  %340 = vadd.xlane.f32.xlu1 %v237_v43  ;;  %338 = vadd.xlane.f32.xlu0 %v236_v44  ;;  %v238_v50 = vsel %vm218_vm2, %v761_v26, 0.0 }
  0x8e   :  { %vm188_vm3 = vcmp.eq.f32.partialorder %v759_v25, %v139_v46  ;;  %vm187_vm4 = vcmp.eq.f32.partialorder %v759_v25, %v134_v47 }
  0x8f   :  { %vm219_vm6 = vmand %vm187_vm4, %vm203_vm1  ;;  %vm208_vm1 = vcmp.ge.s32.totalorder %v753_v22, %v75_v54 }
  0x90   :  { %v239_v49 = vsel %vm219_vm6, %v761_v26, 0.0  ;;  %vm220_vm8 = vmand %vm188_vm3, %vm204_vm5  ;;  %vm209_vm3 = vcmp.ge.s32.totalorder %v753_v22, %v76_v57 }
  0x91   :  { %v149_v52 = vpop.permute.xlu1 %148  ;;  %v144_v53 = vpop.permute.xlu0 %143  ;;  %344 = vadd.xlane.f32.xlu1 %v239_v49  ;;  %342 = vadd.xlane.f32.xlu0 %v238_v50  ;;  %v240_v56 = vsel %vm220_vm8, %v761_v26, 0.0 }
  0x92   :  { %vm190_vm9 = vcmp.eq.f32.partialorder %v759_v25, %v149_v52  ;;  %vm189_vm10 = vcmp.eq.f32.partialorder %v759_v25, %v144_v53 }
  0x93   :  { %vm221_vm12 = vmand %vm189_vm10, %vm205_vm7  ;;  %vm210_vm7 = vcmp.ge.s32.totalorder %v753_v22, %v77_v60 }
  0x94   :  { %v241_v55 = vsel %vm221_vm12, %v761_v26, 0.0  ;;  %vm222_vm14 = vmand %vm190_vm9, %vm206_vm11  ;;  %vm211_vm9 = vcmp.ge.s32.totalorder %v753_v22, %v78_v63 }
  0x95   :  { %v159_v58 = vpop.permute.xlu1 %158  ;;  %v154_v59 = vpop.permute.xlu0 %153  ;;  %348 = vadd.xlane.f32.xlu1 %v241_v55  ;;  %346 = vadd.xlane.f32.xlu0 %v240_v56  ;;  %v242_v62 = vsel %vm222_vm14, %v761_v26, 0.0 }
  0x96   :  { %vm192_vm15 = vcmp.eq.f32.partialorder %v759_v25, %v159_v58  ;;  %vm191_vm0 = vcmp.eq.f32.partialorder %v759_v25, %v154_v59 }
  0x97   :  { %vm223_vm2 = vmand %vm191_vm0, %vm207_vm13  ;;  %vm212_vm13 = vcmp.ge.s32.totalorder %v753_v22, %v79_v18  ;;  %vm364_vm0 = vcmp.gt.f32.partialorder %v659_v2, 0.0 }
  0x98   :  { %v243_v61 = vsel %vm223_vm2, %v761_v26, 0.0  ;;  %vm224_vm4 = vmand %vm192_vm15, %vm208_vm1  ;;  %vm365_vm1 = vcmp.gt.f32.partialorder %v671_v4, 0.0  ;;  %vm366_vm2 = vcmp.gt.f32.partialorder %v654_v1, 0.0 }
  0x99   :  { %v169_v0 = vpop.permute.xlu1 %168  ;;  %v164_v17 = vpop.permute.xlu0 %163  ;;  %352 = vadd.xlane.f32.xlu1 %v243_v61  ;;  %350 = vadd.xlane.f32.xlu0 %v242_v62  ;;  %v244_v21 = vsel %vm224_vm4, %v761_v26, 0.0  ;;  %vm367_vm4 = vcmp.gt.f32.partialorder %v666_v3, 0.0 }
  0x9a   :  { %vm194_vm5 = vcmp.eq.f32.partialorder %v759_v25, %v169_v0  ;;  %vm193_vm6 = vcmp.eq.f32.partialorder %v759_v25, %v164_v17 }
  0x9b   :  { %vm225_vm8 = vmand %vm193_vm6, %vm209_vm3  ;;  %vm368_vm3 = vcmp.gt.f32.partialorder %v683_v6, 0.0  ;;  %vm369_vm6 = vcmp.gt.f32.partialorder %v678_v5, 0.0 }
  0x9c   :  { %v245_v19 = vsel %vm225_vm8, %v761_v26, 0.0  ;;  %vm226_vm10 = vmand %vm194_vm5, %vm210_vm7  ;;  %vm370_vm5 = vcmp.gt.f32.partialorder %v695_v8, 0.0  ;;  %vm372_vm7 = vcmp.gt.f32.partialorder %v707_v10, 0.0  ;;  %vm371_vm8 = vcmp.gt.f32.partialorder %v690_v7, 0.0 }
  0x9d   :  { %v179_v23 = vpop.permute.xlu1 %178  ;;  %v174_v24 = vpop.permute.xlu0 %173  ;;  %356 = vadd.xlane.f32.xlu1 %v245_v19  ;;  %354 = vadd.xlane.f32.xlu0 %v244_v21  ;;  %v246_v27 = vsel %vm226_vm10, %v761_v26, 0.0  ;;  %vm373_vm10 = vcmp.gt.f32.partialorder %v702_v9, 0.0 }
  0x9e   :  { %vm196_vm11 = vcmp.eq.f32.partialorder %v759_v25, %v179_v23  ;;  %vm195_vm12 = vcmp.eq.f32.partialorder %v759_v25, %v174_v24 }
  0x9f   :  { %vm227_vm14 = vmand %vm195_vm12, %vm211_vm9  ;;  %vm374_vm9 = vcmp.gt.f32.partialorder %v719_v12, 0.0  ;;  %vm375_vm12 = vcmp.gt.f32.partialorder %v714_v11, 0.0 }
  0xa0   :  { %v247_v20 = vsel %vm227_vm14, %v761_v26, 0.0  ;;  %vm228_vm15 = vmand %vm196_vm11, %vm212_vm13  ;;  %vm376_vm11 = vcmp.gt.f32.partialorder %v731_v14, 0.0  ;;  %vm378_vm13 = vcmp.gt.f32.partialorder %v743_v16, 0.0  ;;  %vm377_vm14 = vcmp.gt.f32.partialorder %v726_v13, 0.0 }
  0xa1   :  { %360 = vadd.xlane.f32.xlu1 %v247_v20  ;;  %358 = vadd.xlane.f32.xlu0 %v246_v27  ;;  %v248_v28 = vsel %vm228_vm15, %v761_v26, 0.0  ;;  %vm379_vm15 = vcmp.gt.f32.partialorder %v738_v15, 0.0 }
  0xa5   :  { %362 = vadd.xlane.f32.xlu0 %v248_v28 }
 0x112   :  { %v333_v29 = vpop.xlane.xlu0 %332 }
 0x113   :  { %601 = vlog2.f32 %v333_v29 }
 0x116   :  { %v335_v30 = vpop.xlane.xlu1 %334  ;;  %v337_v31 = vpop.xlane.xlu0 %336 }
 0x117   :  { %603 = vlog2.f32 %v335_v30 }
 0x118   :  { %605 = vlog2.f32 %v337_v31 }
 0x11a   :  { %v341_v25 = vpop.xlane.xlu1 %340  ;;  %v339_v32 = vpop.xlane.xlu0 %338 }
 0x11b   :  { %607 = vlog2.f32 %v341_v25 }
 0x11c   :  { %609 = vlog2.f32 %v339_v32 }
 0x11d   :  { %v602_v22 = vpop.eup %601 }
 0x11e   :  { %v381_v33 = vmul.f32 0.6931472, %v602_v22  ;;  %v345_v34 = vpop.xlane.xlu1 %344  ;;  %v343_v35 = vpop.xlane.xlu0 %342 }
 0x11f   :  { %611 = vlog2.f32 %v345_v34 }
 0x120   :  { %613 = vlog2.f32 %v343_v35  ;;  %v412_v36 = vsub.f32 %v659_v2, %v381_v33 }
 0x121   :  { %v604_v26 = vpop.eup %603 }
 0x122   :  { %v606_v37 = vpop.eup %605  ;;  %v383_v38 = vmul.f32 0.6931472, %v604_v26  ;;  %v349_v39 = vpop.xlane.xlu1 %348  ;;  %444 = vrot.lane.b32.xlu1 %v412_v36, %s634_s0 }
 0x123   :  { %v347_v40 = vpop.xlane.xlu0 %346  ;;  %v385_v41 = vmul.f32 0.6931472, %v606_v37  ;;  %615 = vlog2.f32 %v349_v39 }
 0x124   :  { %617 = vlog2.f32 %v347_v40  ;;  %v413_v42 = vsub.f32 %v671_v4, %v383_v38 }
 0x125   :  { %v608_v43 = vpop.eup %607  ;;  %v414_v44 = vsub.f32 %v654_v1, %v385_v41 }
 0x126   :  { %v610_v45 = vpop.eup %609  ;;  %v389_v46 = vmul.f32 0.6931472, %v608_v43  ;;  %v353_v47 = vpop.xlane.xlu1 %352  ;;  %446 = vrot.lane.b32.xlu0 %v413_v42, %s634_s0 }
 0x127   :  { %v351_v48 = vpop.xlane.xlu0 %350  ;;  %v387_v49 = vmul.f32 0.6931472, %v610_v45  ;;  %619 = vlog2.f32 %v353_v47  ;;  %448 = vrot.lane.b32.xlu1 %v414_v44, %s634_s0 }
 0x128   :  { %621 = vlog2.f32 %v351_v48  ;;  %v416_v50 = vsub.f32 %v683_v6, %v389_v46 }
 0x129   :  { %v612_v51 = vpop.eup %611  ;;  %v415_v52 = vsub.f32 %v666_v3, %v387_v49 }
 0x12a   :  { %v614_v53 = vpop.eup %613  ;;  %v393_v54 = vmul.f32 0.6931472, %v612_v51  ;;  %v357_v55 = vpop.xlane.xlu1 %356  ;;  %452 = vrot.lane.b32.xlu0 %v416_v50, %s634_s0 }
 0x12b   :  { %v355_v56 = vpop.xlane.xlu0 %354  ;;  %v391_v57 = vmul.f32 0.6931472, %v614_v53  ;;  %623 = vlog2.f32 %v357_v55  ;;  %450 = vrot.lane.b32.xlu1 %v415_v52, %s634_s0 }
 0x12c   :  { %625 = vlog2.f32 %v355_v56  ;;  %v418_v58 = vsub.f32 %v695_v8, %v393_v54 }
 0x12d   :  { %v616_v59 = vpop.eup %615  ;;  %v417_v60 = vsub.f32 %v678_v5, %v391_v57 }
 0x12e   :  { %v618_v61 = vpop.eup %617  ;;  %v397_v62 = vmul.f32 0.6931472, %v616_v59  ;;  %v361_v63 = vpop.xlane.xlu1 %360  ;;  %456 = vrot.lane.b32.xlu0 %v418_v58, %s634_s0 }
 0x12f   :  { %v359_v0 = vpop.xlane.xlu0 %358  ;;  %v395_v17 = vmul.f32 0.6931472, %v618_v61  ;;  %627 = vlog2.f32 %v361_v63  ;;  %454 = vrot.lane.b32.xlu1 %v417_v60, %s634_s0 }
 0x130   :  { %629 = vlog2.f32 %v359_v0  ;;  %v420_v18 = vsub.f32 %v707_v10, %v397_v62 }
 0x131   :  { %v620_v19 = vpop.eup %619  ;;  %v419_v21 = vsub.f32 %v690_v7, %v395_v17 }
 0x132   :  { %v622_v23 = vpop.eup %621  ;;  %v401_v24 = vmul.f32 0.6931472, %v620_v19  ;;  %460 = vrot.lane.b32.xlu0 %v420_v18, %s634_s0 }
 0x133   :  { %v363_v20 = vpop.xlane.xlu0 %362  ;;  %v399_v27 = vmul.f32 0.6931472, %v622_v23  ;;  %458 = vrot.lane.b32.xlu1 %v419_v21, %s634_s0 }
 0x134   :  { %631 = vlog2.f32 %v363_v20  ;;  %v422_v28 = vsub.f32 %v719_v12, %v401_v24 }
 0x135   :  { %v624_v29 = vpop.eup %623  ;;  %v421_v30 = vsub.f32 %v702_v9, %v399_v27 }
 0x136   :  { %v626_v31 = vpop.eup %625  ;;  %v405_v25 = vmul.f32 0.6931472, %v624_v29  ;;  %464 = vrot.lane.b32.xlu0 %v422_v28, %s634_s0 }
 0x137   :  { %v403_v32 = vmul.f32 0.6931472, %v626_v31  ;;  %462 = vrot.lane.b32.xlu1 %v421_v30, %s634_s0 }
 0x138   :  { %v424_v22 = vsub.f32 %v731_v14, %v405_v25 }
 0x139   :  { %v628_v33 = vpop.eup %627  ;;  %v423_v34 = vsub.f32 %v714_v11, %v403_v32 }
 0x13a   :  { %v630_v35 = vpop.eup %629  ;;  %v409_v36 = vmul.f32 0.6931472, %v628_v33  ;;  %468 = vrot.lane.b32.xlu0 %v424_v22, %s634_s0 }
 0x13b   :  { %v407_v26 = vmul.f32 0.6931472, %v630_v35  ;;  %466 = vrot.lane.b32.xlu1 %v423_v34, %s634_s0 }
 0x13c   :  { %v426_v37 = vsub.f32 %v743_v16, %v409_v36 }
 0x13d   :  { %v425_v39 = vsub.f32 %v726_v13, %v407_v26 }
 0x13e   :  { %v632_v38 = vpop.eup %631  ;;  %472 = vrot.lane.b32.xlu0 %v426_v37, %s634_s0 }
 0x13f   :  { %v411_v40 = vmul.f32 0.6931472, %v632_v38  ;;  %470 = vrot.lane.b32.xlu1 %v425_v39, %s634_s0 }
 0x141   :  { %v427_v41 = vsub.f32 %v738_v15, %v411_v40 }
 0x143   :  { %474 = vrot.lane.b32.xlu1 %v427_v41, %s634_s0 }
 0x194   :  { %v445_v42 = vpop.permute.xlu1 %444 }
 0x195   :  { %v492_v43 = vsel %vm364_vm0, %v445_v42, 0.0  ;;  %vm572_vm0 = vcmask 7168  }
 0x196   :  { %524 = vrot.lane.b32.xlu0 %v492_v43, %s635_s16 }
 0x198   :  { %v447_v44 = vpop.permute.xlu0 %446 }
 0x199   :  { %v449_v45 = vpop.permute.xlu1 %448  ;;  %v493_v46 = vsel %vm365_vm1, %v447_v44, 0.0 }
 0x19a   :  { %v494_v47 = vsel %vm366_vm2, %v449_v45, 0.0  ;;  %526 = vrot.lane.b32.xlu1 %v493_v46, %s635_s16 }
 0x19b   :  { %528 = vrot.lane.b32.xlu0 %v494_v47, %s635_s16 }
 0x19c   :  { %v453_v2 = vpop.permute.xlu0 %452 }
 0x19d   :  { %v451_v48 = vpop.permute.xlu1 %450  ;;  %v496_v49 = vsel %vm368_vm3, %v453_v2, 0.0 }
 0x19e   :  { %v495_v50 = vsel %vm367_vm4, %v451_v48, 0.0 }
 0x19f   :  { %530 = vrot.lane.b32.xlu1 %v495_v50, %s635_s16  ;;  %532 = vrot.lane.b32.xlu0 %v496_v49, %s635_s16 }
 0x1a0   :  { %v457_v1 = vpop.permute.xlu0 %456 }
 0x1a1   :  { %v455_v4 = vpop.permute.xlu1 %454  ;;  %v498_v51 = vsel %vm370_vm5, %v457_v1, 0.0 }
 0x1a2   :  { %v497_v6 = vsel %vm369_vm6, %v455_v4, 0.0 }
 0x1a3   :  { %534 = vrot.lane.b32.xlu1 %v497_v6, %s635_s16  ;;  %536 = vrot.lane.b32.xlu0 %v498_v51, %s635_s16 }
 0x1a4   :  { %v461_v3 = vpop.permute.xlu0 %460 }
 0x1a5   :  { %v459_v8 = vpop.permute.xlu1 %458  ;;  %v500_v52 = vsel %vm372_vm7, %v461_v3, 0.0 }
 0x1a6   :  { %v499_v53 = vsel %vm371_vm8, %v459_v8, 0.0 }
 0x1a7   :  { %538 = vrot.lane.b32.xlu1 %v499_v53, %s635_s16  ;;  %540 = vrot.lane.b32.xlu0 %v500_v52, %s635_s16 }
 0x1a8   :  { %v465_v5 = vpop.permute.xlu0 %464 }
 0x1a9   :  { %v463_v10 = vpop.permute.xlu1 %462  ;;  %v502_v54 = vsel %vm374_vm9, %v465_v5, 0.0 }
 0x1aa   :  { %v501_v55 = vsel %vm373_vm10, %v463_v10, 0.0 }
 0x1ab   :  { %542 = vrot.lane.b32.xlu1 %v501_v55, %s635_s16  ;;  %544 = vrot.lane.b32.xlu0 %v502_v54, %s635_s16 }
 0x1ac   :  { %v469_v7 = vpop.permute.xlu0 %468 }
 0x1ad   :  { %v467_v12 = vpop.permute.xlu1 %466  ;;  %v504_v56 = vsel %vm376_vm11, %v469_v7, 0.0 }
 0x1ae   :  { %v503_v57 = vsel %vm375_vm12, %v467_v12, 0.0 }
 0x1af   :  { %546 = vrot.lane.b32.xlu1 %v503_v57, %s635_s16  ;;  %548 = vrot.lane.b32.xlu0 %v504_v56, %s635_s16 }
 0x1b0   :  { %v473_v9 = vpop.permute.xlu0 %472 }
 0x1b1   :  { %v471_v14 = vpop.permute.xlu1 %470  ;;  %v506_v58 = vsel %vm378_vm13, %v473_v9, 0.0 }
 0x1b2   :  { %v505_v59 = vsel %vm377_vm14, %v471_v14, 0.0 }
 0x1b3   :  { %550 = vrot.lane.b32.xlu1 %v505_v59, %s635_s16  ;;  %552 = vrot.lane.b32.xlu0 %v506_v58, %s635_s16 }
 0x1b5   :  { %v475_v11 = vpop.permute.xlu1 %474 }
 0x1b6   :  { %v507_v60 = vsel %vm379_vm15, %v475_v11, 0.0 }
 0x1b7   :  { %554 = vrot.lane.b32.xlu1 %v507_v60, %s635_s16 }
 0x208   :  { %v525_v16 = vpop.permute.xlu0 %524 }
 0x209   :  { %573 = vst.msk [vmem:[%s962_s2] sm:$0xff] %vm572_vm0, %v525_v16 }
 0x20c   :  { %v527_v13 = vpop.permute.xlu1 %526 }
 0x20d   :  { %574 = vst.msk [vmem:[%s962_s2 + $0x8] sm:$0xff] %vm572_vm0, %v527_v13  ;;  %v529_v61 = vpop.permute.xlu0 %528 }
 0x20e   :  { %575 = vst.msk [vmem:[%s962_s2 + $0x10] sm:$0xff] %vm572_vm0, %v529_v61 }
 0x211   :  { %v531_v15 = vpop.permute.xlu1 %530  ;;  %v533_v62 = vpop.permute.xlu0 %532 }
 0x212   :  { %576 = vst.msk [vmem:[%s962_s2 + $0x18] sm:$0xff] %vm572_vm0, %v531_v15  ;;  %577 = vst.msk [vmem:[%s962_s2 + $0x20] sm:$0xff] %vm572_vm0, %v533_v62 }
 0x215   :  { %v535_v63 = vpop.permute.xlu1 %534  ;;  %v537_v0 = vpop.permute.xlu0 %536 }
 0x216   :  { %578 = vst.msk [vmem:[%s962_s2 + $0x28] sm:$0xff] %vm572_vm0, %v535_v63  ;;  %579 = vst.msk [vmem:[%s962_s2 + $0x30] sm:$0xff] %vm572_vm0, %v537_v0 }
 0x219   :  { %v539_v17 = vpop.permute.xlu1 %538  ;;  %v541_v18 = vpop.permute.xlu0 %540 }
 0x21a   :  { %580 = vst.msk [vmem:[%s962_s2 + $0x38] sm:$0xff] %vm572_vm0, %v539_v17  ;;  %581 = vst.msk [vmem:[%s962_s2 + $0x40] sm:$0xff] %vm572_vm0, %v541_v18 }
 0x21d   :  { %v543_v19 = vpop.permute.xlu1 %542  ;;  %v545_v21 = vpop.permute.xlu0 %544 }
 0x21e   :  { %582 = vst.msk [vmem:[%s962_s2 + $0x48] sm:$0xff] %vm572_vm0, %v543_v19  ;;  %583 = vst.msk [vmem:[%s962_s2 + $0x50] sm:$0xff] %vm572_vm0, %v545_v21 }
 0x221   :  { %v547_v23 = vpop.permute.xlu1 %546  ;;  %v549_v24 = vpop.permute.xlu0 %548 }
 0x222   :  { %584 = vst.msk [vmem:[%s962_s2 + $0x58] sm:$0xff] %vm572_vm0, %v547_v23  ;;  %585 = vst.msk [vmem:[%s962_s2 + $0x60] sm:$0xff] %vm572_vm0, %v549_v24 }
 0x225   :  { %v551_v20 = vpop.permute.xlu1 %550  ;;  %v553_v27 = vpop.permute.xlu0 %552 }
 0x226   :  { %586 = vst.msk [vmem:[%s962_s2 + $0x68] sm:$0xff] %vm572_vm0, %v551_v20  ;;  %587 = vst.msk [vmem:[%s962_s2 + $0x70] sm:$0xff] %vm572_vm0, %v553_v27 }
 0x229   :  { %v555_v28 = vpop.permute.xlu1 %554 }
 0x22a   :  { %588 = vst.msk [vmem:[%s962_s2 + $0x78] sm:$0xff] %vm572_vm0, %v555_v28 }

</bundles_post_ra>
